<compile_context>
chip_gen: v5e
topology: v5e:2x2
jax: 0.10.0
libtpu: 0.0.40
codegen_flags: <defaults>
</compile_context>

<pallas_src>
import jax
import jax.numpy as jnp
from jax.experimental import pallas as pl
from jax.experimental.pallas import tpu as pltpu

_LANE = 128


def _round_up(x: int, m: int) -> int:
    return ((x + m - 1) // m) * m


# --------------------------------------------------------------------------- kernels
def _make_fused_kernel(n_layers: int, compute_dtype):
    """Single-shot fused kernel: all layers in one grid step per batch tile.

    Ref order: x_ref, (w0, b0, ..., w_{L-1}, b_{L-1}), o_ref.
    x is cast to compute_dtype in-kernel; accumulation is f32; ReLU after every
    layer except the last (Dropout is identity in eval mode).
    """

    def kernel(*refs):
        x_ref = refs[0]
        o_ref = refs[-1]
        wb = refs[1:-1]

        h = x_ref[...].astype(compute_dtype)          # VPU cast hides under MXU
        acc = None
        for i in range(n_layers):
            w = wb[2 * i][...]                        # (d_in, d_out_pad), compute dtype
            b = wb[2 * i + 1][...]                    # (1, d_out_pad), f32
            acc = jnp.dot(h, w, preferred_element_type=jnp.float32) + b
            if i < n_layers - 1:
                h = jnp.maximum(acc, 0.0).astype(compute_dtype)
        o_ref[...] = acc.astype(o_ref.dtype)          # lane-dense (bt, 128*) store

    return kernel


def _make_ktiled_kernel(n_layers: int, compute_dtype):
    """K-tiled kernel: the first Linear layer is reduced over grid axis 1.

    Ref order: x_ref, (w0, b0, ..., w_{L-1}, b_{L-1}), o_ref, acc_ref (f32 scratch).
    acc init at k==0; MLP tail + output store at k==last (output block is resident
    across the 'arbitrary' K axis).
    """

    def kernel(*refs):
        x_ref = refs[0]
        wb = refs[1:-2]
        o_ref = refs[-2]
        acc_ref = refs[-1]
        k = pl.program_id(1)

        @pl.when(k == 0)
        def _():
            acc_ref[...] = jnp.zeros_like(acc_ref)

        x = x_ref[...].astype(compute_dtype)
        acc_ref[...] += jnp.dot(x, wb[0][...], preferred_element_type=jnp.float32)

        @pl.when(k == pl.num_programs(1) - 1)
        def _():
            z = acc_ref[...] + wb[1][...]             # add first-layer bias (f32)
            if n_layers == 1:
                o_ref[...] = z.astype(o_ref.dtype)
                return
            h = jnp.maximum(z, 0.0).astype(compute_dtype)
            out = None
            for i in range(1, n_layers):
                w = wb[2 * i][...]
                b = wb[2 * i + 1][...]
                out = jnp.dot(h, w, preferred_element_type=jnp.float32) + b
                if i < n_layers - 1:
                    h = jnp.maximum(out, 0.0).astype(compute_dtype)
            o_ref[...] = out.astype(o_ref.dtype)

    return kernel


# --------------------------------------------------------------- parameter preparation
def prepare_params(params, *, compute_dtype=jnp.bfloat16,
                   k_split_threshold=2048, k_tile=None):
    """Pad/cast the Linear parameters ONCE (cache the result across forward calls).

    params: list of (W, b) with W shaped (in_dim, out_dim), b shaped (1, out_dim)
            or (out_dim,).
    Output dims are zero-padded to 128-lane multiples (head: 1 -> 128 for a
    lane-dense output); weights are cast to `compute_dtype`, biases kept f32.
    If the first layer's in_dim K >= k_split_threshold (or k_tile is given), a
    K-tile size is chosen for the K-tiled kernel path and the first weight's
    in_dim is padded to a multiple of it.
    """
    n_layers = len(params)
    K = int(params[0][0].shape[0])

    tk = None
    if k_tile is not None:
        tk = int(k_tile)
    elif K >= k_split_threshold:
        for cand in (2048, 1024, 512, 256, 128):      # prefer a tile that divides K
            if K % cand == 0:
                tk = cand
                break
        if tk is None:
            tk = 512                                  # fall back: pad K to 512 multiple
    K_in = _round_up(K, tk) if tk is not None else K

    layers = []
    in_dim = K_in
    for (w, b) in params:
        d_in, d_out = int(w.shape[0]), int(w.shape[1])
        d_out_pad = _round_up(d_out, _LANE)
        w_p = jnp.zeros((in_dim, d_out_pad), compute_dtype)
        w_p = w_p.at[:d_in, :d_out].set(jnp.asarray(w, dtype=compute_dtype))
        b_arr = jnp.asarray(b, dtype=jnp.float32).reshape(1, -1)
        b_p = jnp.zeros((1, d_out_pad), jnp.float32).at[:, :d_out].set(b_arr)
        layers.append((w_p, b_p))
        in_dim = d_out_pad

    return {
        "layers": layers,
        "n_layers": n_layers,
        "K": K,
        "K_in": K_in,
        "k_tile": tk,
        "compute_dtype": compute_dtype,
        "out_width": in_dim,                           # padded head width (>=128)
    }


# --------------------------------------------------------------------------- forward
def full_embedding_mlp_forward(x, prepared, *, batch_tile=128):
    """Fused FullEmbeddingMLP forward.

    x:        (B, 1, seq_len, embed_dim) or (B, seq_len, embed_dim), float32
    prepared: output of prepare_params() (pre-padded / pre-cast weights).
    batch_tile: rows per grid step (128 default; pass 256 on v6e for large B).
                Clamped to round_up(B, 16) for small batches and split so the
                batch grid has >=2 tiles when possible (v7x megacore).
    returns (B, 1) float32
    """
    compute_dtype = prepared["compute_dtype"]
    n_layers = prepared["n_layers"]
    layers = prepared["layers"]
    K = prepared["K"]
    K_in = prepared["K_in"]
    tk = prepared["k_tile"]
    out_width = prepared["out_width"]

    # ---- glue (plain JAX): squeeze + flatten, exactly like the PyTorch module ----
    if x.ndim == 4 and x.shape[1] == 1:
        x = jnp.squeeze(x, axis=1)
    B = x.shape[0]
    x_flat = x.reshape(B, -1).astype(jnp.float32)      # no bf16 HBM copy; cast in-kernel
    assert x_flat.shape[1] == K, "input feature size does not match prepared params"

    # ---- batch tiling: clamp for small B, ensure >=2 tiles when possible ----
    batch_tile = _round_up(max(16, min(int(batch_tile), _round_up(B, 16))), 16)
    B_pad = _round_up(B, batch_tile)
    while B_pad // batch_tile < 2 and batch_tile > 16 and (batch_tile // 2) % 8 == 0:
        batch_tile //= 2
        B_pad = _round_up(B, batch_tile)

    pad_rows = B_pad - B
    pad_cols = K_in - K
    if pad_rows or pad_cols:
        x_flat = jnp.pad(x_flat, ((0, pad_rows), (0, pad_cols)))

    flat_params = []
    for w_p, b_p in layers:
        flat_params += [w_p, b_p]

    itemsize_x = x_flat.dtype.itemsize
    cd_size = jnp.dtype(compute_dtype).itemsize

    # ---- grid / specs ----
    if tk is None:
        # Single-shot: everything resident, one grid step per batch tile.
        grid = (B_pad // batch_tile,)
        kernel = _make_fused_kernel(n_layers, compute_dtype)
        in_specs = [pl.BlockSpec((batch_tile, K_in), lambda i: (i, 0))]
        for w_p, b_p in layers:
            # Constant blocks: single-buffer (index never changes; 2x buys nothing).
            in_specs.append(pl.BlockSpec(w_p.shape, lambda i: (0, 0),
                                         pipeline_mode=pl.Buffered(1)))
            in_specs.append(pl.BlockSpec(b_p.shape, lambda i: (0, 0),
                                         pipeline_mode=pl.Buffered(1)))
        out_specs = pl.BlockSpec((batch_tile, out_width), lambda i: (i, 0))
        scratch_shapes = []
        dim_sem = ("parallel",)
        vmem_need = 2 * batch_tile * K_in * itemsize_x
    else:
        # K-tiled first layer: stream x and w0 over K, accumulate in f32 VMEM scratch.
        nk = K_in // tk
        grid = (B_pad // batch_tile, nk)
        kernel = _make_ktiled_kernel(n_layers, compute_dtype)
        d0_pad = layers[0][0].shape[1]
        in_specs = [pl.BlockSpec((batch_tile, tk), lambda i, k: (i, k))]
        in_specs.append(pl.BlockSpec((tk, d0_pad), lambda i, k: (k, 0)))   # streams: 2-buf
        in_specs.append(pl.BlockSpec(layers[0][1].shape, lambda i, k: (0, 0),
                                     pipeline_mode=pl.Buffered(1)))
        for w_p, b_p in layers[1:]:
            in_specs.append(pl.BlockSpec(w_p.shape, lambda i, k: (0, 0),
                                         pipeline_mode=pl.Buffered(1)))
            in_specs.append(pl.BlockSpec(b_p.shape, lambda i, k: (0, 0),
                                         pipeline_mode=pl.Buffered(1)))
        out_specs = pl.BlockSpec((batch_tile, out_width), lambda i, k: (i, 0))
        scratch_shapes = [pltpu.VMEM((batch_tile, d0_pad), jnp.float32)]
        dim_sem = ("parallel", "arbitrary")
        vmem_need = 2 * batch_tile * tk * itemsize_x
        vmem_need += batch_tile * d0_pad * 4                      # f32 accumulator

    # weights/biases: single-buffered constants (w0 double-buffered when K-tiled)
    for li, (w_p, b_p) in enumerate(layers):
        bufs = 2 if (tk is not None and li == 0) else 1
        vmem_need += bufs * w_p.size * cd_size + b_p.size * 4
    vmem_need += 2 * batch_tile * out_width * 4                   # double-buffered output

    # ---- generation-aware scoped VMEM limit ----
    phys_vmem = 64 << 20                                          # conservative fallback
    try:
        phys_vmem = int(pltpu.get_tpu_info().vmem_capacity_bytes)
    except Exception:
        pass
    cap = min(100 << 20, phys_vmem * 85 // 100)                   # ~100 MiB on 128-MiB parts,
    vmem_limit = None                                             # ~54 MiB on 64-MiB v7x
    if vmem_need > (14 << 20):
        vmem_limit = int(min(max(vmem_need * 5 // 4, 16 << 20), cap))

    # ---- cost estimate (lets XLA schedule around the custom call) ----
    flops = 0
    bytes_accessed = x_flat.size * itemsize_x + B_pad * out_width * 4
    for w_p, b_p in layers:
        flops += 2 * B_pad * int(w_p.shape[0]) * int(w_p.shape[1])
        bytes_accessed += w_p.size * cd_size + b_p.size * 4
    cost = pl.CostEstimate(flops=int(flops), transcendentals=0,
                           bytes_accessed=int(bytes_accessed))

    out_padded = pl.pallas_call(
        kernel,
        out_shape=jax.ShapeDtypeStruct((B_pad, out_width), jnp.float32),
        grid=grid,
        in_specs=in_specs,
        out_specs=out_specs,
        scratch_shapes=scratch_shapes,
        compiler_params=pltpu.CompilerParams(
            dimension_semantics=dim_sem,
            vmem_limit_bytes=vmem_limit,
        ),
        cost_estimate=cost,
    )(x_flat, *flat_params)

    # Real head output lives in column 0; drop batch padding.
    return out_padded[:B, 0:1]


# ------------------------------------------------------------------------- test utils
def init_params(key, seq_len, embed_dim, projection_dim, mlp_hidden_dims):
    """Synthetic init mirroring the PyTorch layer shapes.

    Layer dims: (seq_len*embed_dim -> projection_dim) -> hidden dims... -> 1
    Weights returned pre-transposed to (in_dim, out_dim); biases as (1, out_dim).
    """
    dims = [seq_len * embed_dim, projection_dim] + list(mlp_hidden_dims) + [1]
    params = []
    for i in range(len(dims) - 1):
        d_in, d_out = dims[i], dims[i + 1]
        key, kw, kb = jax.random.split(key, 3)
        scale = 1.0 / jnp.sqrt(jnp.float32(d_in))
        w = jax.random.uniform(kw, (d_in, d_out), jnp.float32, -scale, scale)
        b = jax.random.uniform(kb, (1, d_out), jnp.float32, -scale, scale)
        params.append((w, b))
    return params


def _reference_forward(x, params, compute_dtype=None):
    """Pure-JAX reference. With compute_dtype set, mirrors the kernel's bf16/f32 math."""
    if x.ndim == 4 and x.shape[1] == 1:
        x = jnp.squeeze(x, axis=1)
    h = x.reshape(x.shape[0], -1)
    n = len(params)
    for i, (w, b) in enumerate(params):
        if compute_dtype is not None:
            z = jnp.dot(h.astype(compute_dtype), w.astype(compute_dtype),
                        preferred_element_type=jnp.float32) + b
        else:
            z = h @ w + b
        h = jnp.maximum(z, 0.0) if i < n - 1 else z
    return h


if __name__ == "__main__":
    # Small, module-consistent shapes.
    B, seq_len, embed_dim = 8, 8, 32
    projection_dim = 64
    mlp_hidden_dims = [32, 16]
    # mlp_dropout_rates = [0.1, 0.1, 0.1]  # identity in eval mode; unused here

    key = jax.random.PRNGKey(0)
    key, kx = jax.random.split(key)
    x = jax.random.normal(kx, (B, 1, seq_len, embed_dim), jnp.float32)
    params = init_params(key, seq_len, embed_dim, projection_dim, mlp_hidden_dims)

    ref_bf16 = _reference_forward(x, params, compute_dtype=jnp.bfloat16)
    ref_f32 = _reference_forward(x, params)

    # Path 1: single-shot fused kernel (small K -> no K tiling).
    prepared = prepare_params(params)
    out = jax.block_until_ready(full_embedding_mlp_forward(x, prepared))
    assert out.shape == (B, 1)
    assert jnp.allclose(out, ref_bf16, atol=2e-2, rtol=2e-2), (
        "single-shot path mismatch vs bf16-matched reference")
    assert jnp.allclose(out, ref_f32, atol=1e-1, rtol=1e-1), (
        "single-shot path mismatch vs float32 reference")

    # Path 2: force the K-tiled first layer (the path used for large seq_len*embed_dim).
    prepared_kt = prepare_params(params, k_tile=128)        # K=256 -> 2 K tiles
    out_kt = jax.block_until_ready(full_embedding_mlp_forward(x, prepared_kt))
    assert out_kt.shape == (B, 1)
    assert jnp.allclose(out_kt, ref_bf16, atol=2e-2, rtol=2e-2), (
        "K-tiled path mismatch vs bf16-matched reference")
    assert jnp.allclose(out_kt, ref_f32, atol=1e-1, rtol=1e-1), (
        "K-tiled path mismatch vs float32 reference")

    print("KERNEL_OK")
</pallas_src>

<mosaic_0001>
module attributes {stable_mosaic.version = 11 : i64} {
  func.func @kernel(%arg0: i32, %arg1: memref<16x256xf32, #tpu.memory_space<vmem>>, %arg2: memref<256x128xbf16, #tpu.memory_space<vmem>>, %arg3: memref<1x128xf32, #tpu.memory_space<vmem>>, %arg4: memref<128x128xbf16, #tpu.memory_space<vmem>>, %arg5: memref<1x128xf32, #tpu.memory_space<vmem>>, %arg6: memref<128x128xbf16, #tpu.memory_space<vmem>>, %arg7: memref<1x128xf32, #tpu.memory_space<vmem>>, %arg8: memref<128x128xbf16, #tpu.memory_space<vmem>>, %arg9: memref<1x128xf32, #tpu.memory_space<vmem>>, %arg10: memref<16x128xf32, #tpu.memory_space<vmem>>) attributes {dimension_semantics = [#tpu.dimension_semantics<parallel>], iteration_bounds = array<i64: 1>, scalar_prefetch = 0 : i64, scratch_operands = 0 : i64, tpu.core_type = #tpu.core_type<tc>, window_params = [{transform_indices = @transform_0, window_bounds = array<i64: 16, 256>}, {pipeline_mode = #tpu.pipeline_mode<synchronous>, transform_indices = @transform_1, window_bounds = array<i64: 256, 128>}, {pipeline_mode = #tpu.pipeline_mode<synchronous>, transform_indices = @transform_2, window_bounds = array<i64: 1, 128>}, {pipeline_mode = #tpu.pipeline_mode<synchronous>, transform_indices = @transform_3, window_bounds = array<i64: 128, 128>}, {pipeline_mode = #tpu.pipeline_mode<synchronous>, transform_indices = @transform_4, window_bounds = array<i64: 1, 128>}, {pipeline_mode = #tpu.pipeline_mode<synchronous>, transform_indices = @transform_5, window_bounds = array<i64: 128, 128>}, {pipeline_mode = #tpu.pipeline_mode<synchronous>, transform_indices = @transform_6, window_bounds = array<i64: 1, 128>}, {pipeline_mode = #tpu.pipeline_mode<synchronous>, transform_indices = @transform_7, window_bounds = array<i64: 128, 128>}, {pipeline_mode = #tpu.pipeline_mode<synchronous>, transform_indices = @transform_8, window_bounds = array<i64: 1, 128>}, {transform_indices = @transform_9, window_bounds = array<i64: 16, 128>}]} {
    %c0 = arith.constant 0 : index
    %c0_0 = arith.constant 0 : index
    %0 = vector.load %arg1[%c0, %c0_0] : memref<16x256xf32, #tpu.memory_space<vmem>>, vector<16x256xf32>
    %1 = arith.truncf %0 : vector<16x256xf32> to vector<16x256xbf16>
    %c0_1 = arith.constant 0 : index
    %c0_2 = arith.constant 0 : index
    %2 = vector.load %arg2[%c0_1, %c0_2] : memref<256x128xbf16, #tpu.memory_space<vmem>>, vector<256x128xbf16>
    %c0_3 = arith.constant 0 : index
    %c0_4 = arith.constant 0 : index
    %3 = vector.load %arg3[%c0_3, %c0_4] : memref<1x128xf32, #tpu.memory_space<vmem>>, vector<1x128xf32>
    %cst = arith.constant dense<0.000000e+00> : vector<16x128xf32>
    %4 = tpu.matmul %1, %2, %cst {dimension_numbers = #tpu.dot_dimension_numbers<[1], [0], [0], [1], [0, 0, 1, 1], [], []>} : vector<16x256xbf16>, vector<256x128xbf16>, vector<16x128xf32> -> vector<16x128xf32>
    %5 = vector.broadcast %3 : vector<1x128xf32> to vector<16x128xf32>
    %6 = arith.addf %4, %5 : vector<16x128xf32>
    %cst_5 = arith.constant 0.000000e+00 : f32
    %7 = vector.broadcast %cst_5 : f32 to vector<16x128xf32>
    %8 = arith.maximumf %6, %7 : vector<16x128xf32>
    %9 = arith.truncf %8 : vector<16x128xf32> to vector<16x128xbf16>
    %c0_6 = arith.constant 0 : index
    %c0_7 = arith.constant 0 : index
    %10 = vector.load %arg4[%c0_6, %c0_7] : memref<128x128xbf16, #tpu.memory_space<vmem>>, vector<128x128xbf16>
    %c0_8 = arith.constant 0 : index
    %c0_9 = arith.constant 0 : index
    %11 = vector.load %arg5[%c0_8, %c0_9] : memref<1x128xf32, #tpu.memory_space<vmem>>, vector<1x128xf32>
    %cst_10 = arith.constant dense<0.000000e+00> : vector<16x128xf32>
    %12 = tpu.matmul %9, %10, %cst_10 {dimension_numbers = #tpu.dot_dimension_numbers<[1], [0], [0], [1], [0, 0, 1, 1], [], []>} : vector<16x128xbf16>, vector<128x128xbf16>, vector<16x128xf32> -> vector<16x128xf32>
    %13 = vector.broadcast %11 : vector<1x128xf32> to vector<16x128xf32>
    %14 = arith.addf %12, %13 : vector<16x128xf32>
    %cst_11 = arith.constant 0.000000e+00 : f32
    %15 = vector.broadcast %cst_11 : f32 to vector<16x128xf32>
    %16 = arith.maximumf %14, %15 : vector<16x128xf32>
    %17 = arith.truncf %16 : vector<16x128xf32> to vector<16x128xbf16>
    %c0_12 = arith.constant 0 : index
    %c0_13 = arith.constant 0 : index
    %18 = vector.load %arg6[%c0_12, %c0_13] : memref<128x128xbf16, #tpu.memory_space<vmem>>, vector<128x128xbf16>
    %c0_14 = arith.constant 0 : index
    %c0_15 = arith.constant 0 : index
    %19 = vector.load %arg7[%c0_14, %c0_15] : memref<1x128xf32, #tpu.memory_space<vmem>>, vector<1x128xf32>
    %cst_16 = arith.constant dense<0.000000e+00> : vector<16x128xf32>
    %20 = tpu.matmul %17, %18, %cst_16 {dimension_numbers = #tpu.dot_dimension_numbers<[1], [0], [0], [1], [0, 0, 1, 1], [], []>} : vector<16x128xbf16>, vector<128x128xbf16>, vector<16x128xf32> -> vector<16x128xf32>
    %21 = vector.broadcast %19 : vector<1x128xf32> to vector<16x128xf32>
    %22 = arith.addf %20, %21 : vector<16x128xf32>
    %cst_17 = arith.constant 0.000000e+00 : f32
    %23 = vector.broadcast %cst_17 : f32 to vector<16x128xf32>
    %24 = arith.maximumf %22, %23 : vector<16x128xf32>
    %25 = arith.truncf %24 : vector<16x128xf32> to vector<16x128xbf16>
    %c0_18 = arith.constant 0 : index
    %c0_19 = arith.constant 0 : index
    %26 = vector.load %arg8[%c0_18, %c0_19] : memref<128x128xbf16, #tpu.memory_space<vmem>>, vector<128x128xbf16>
    %c0_20 = arith.constant 0 : index
    %c0_21 = arith.constant 0 : index
    %27 = vector.load %arg9[%c0_20, %c0_21] : memref<1x128xf32, #tpu.memory_space<vmem>>, vector<1x128xf32>
    %cst_22 = arith.constant dense<0.000000e+00> : vector<16x128xf32>
    %28 = tpu.matmul %25, %26, %cst_22 {dimension_numbers = #tpu.dot_dimension_numbers<[1], [0], [0], [1], [0, 0, 1, 1], [], []>} : vector<16x128xbf16>, vector<128x128xbf16>, vector<16x128xf32> -> vector<16x128xf32>
    %29 = vector.broadcast %27 : vector<1x128xf32> to vector<16x128xf32>
    %30 = arith.addf %28, %29 : vector<16x128xf32>
    %c0_23 = arith.constant 0 : index
    %c0_24 = arith.constant 0 : index
    %31 = vector.load %arg10[%c0_23, %c0_24] : memref<16x128xf32, #tpu.memory_space<vmem>>, vector<16x128xf32>
    tpu.vector_store %arg10[%c0_23, %c0_24], %30 {strides = array<i32>} : memref<16x128xf32, #tpu.memory_space<vmem>>, vector<16x128xf32>,
    return
  }
  func.func @transform_0(%arg0: i32) -> (i32, i32) {
    %c0_i32 = arith.constant 0 : i32
    %c0_i32_0 = arith.constant 0 : i32
    return %arg0, %c0_i32 : i32, i32
  }
  func.func @transform_1(%arg0: i32) -> (i32, i32) {
    %c0_i32 = arith.constant 0 : i32
    %c0_i32_0 = arith.constant 0 : i32
    %c0_i32_1 = arith.constant 0 : i32
    return %c0_i32, %c0_i32_0 : i32, i32
  }
  func.func @transform_2(%arg0: i32) -> (i32, i32) {
    %c0_i32 = arith.constant 0 : i32
    %c0_i32_0 = arith.constant 0 : i32
    %c0_i32_1 = arith.constant 0 : i32
    return %c0_i32, %c0_i32_0 : i32, i32
  }
  func.func @transform_3(%arg0: i32) -> (i32, i32) {
    %c0_i32 = arith.constant 0 : i32
    %c0_i32_0 = arith.constant 0 : i32
    %c0_i32_1 = arith.constant 0 : i32
    return %c0_i32, %c0_i32_0 : i32, i32
  }
  func.func @transform_4(%arg0: i32) -> (i32, i32) {
    %c0_i32 = arith.constant 0 : i32
    %c0_i32_0 = arith.constant 0 : i32
    %c0_i32_1 = arith.constant 0 : i32
    return %c0_i32, %c0_i32_0 : i32, i32
  }
  func.func @transform_5(%arg0: i32) -> (i32, i32) {
    %c0_i32 = arith.constant 0 : i32
    %c0_i32_0 = arith.constant 0 : i32
    %c0_i32_1 = arith.constant 0 : i32
    return %c0_i32, %c0_i32_0 : i32, i32
  }
  func.func @transform_6(%arg0: i32) -> (i32, i32) {
    %c0_i32 = arith.constant 0 : i32
    %c0_i32_0 = arith.constant 0 : i32
    %c0_i32_1 = arith.constant 0 : i32
    return %c0_i32, %c0_i32_0 : i32, i32
  }
  func.func @transform_7(%arg0: i32) -> (i32, i32) {
    %c0_i32 = arith.constant 0 : i32
    %c0_i32_0 = arith.constant 0 : i32
    %c0_i32_1 = arith.constant 0 : i32
    return %c0_i32, %c0_i32_0 : i32, i32
  }
  func.func @transform_8(%arg0: i32) -> (i32, i32) {
    %c0_i32 = arith.constant 0 : i32
    %c0_i32_0 = arith.constant 0 : i32
    %c0_i32_1 = arith.constant 0 : i32
    return %c0_i32, %c0_i32_0 : i32, i32
  }
  func.func @transform_9(%arg0: i32) -> (i32, i32) {
    %c0_i32 = arith.constant 0 : i32
    %c0_i32_0 = arith.constant 0 : i32
    return %arg0, %c0_i32 : i32, i32
  }
}

</mosaic_0001>

<bundles_post_ra>
// kernel: tpu_custom_call.1
= control target key start
LH: loop header
LB: loop body
LE: loop exit
PB: predicated region body
PF: predicated region fallthrough
CT: control target
= control target key end

     0   :  { %14 = vsyncpa [#allocation3], 0  ;;  %s1027_s0 = inlined_call_operand.hbm [shape: f32[16,256], index: 0, kind: input, shape index: {}]   ;;  %s1028_s1 = inlined_call_operand.hbm [shape: bf16[256,128], index: 1, kind: input, shape index: {}]   ;;  %s1029_s2 = inlined_call_operand.vmem [shape: f32[1,128], index: 2, kind: input, shape index: {}]   ;;  %s1030_s3 = inlined_call_operand.hbm [shape: bf16[128,128], index: 3, kind: input, shape index: {}]   ;;  %s1031_s4 = inlined_call_operand.vmem [shape: f32[1,128], index: 4, kind: input, shape index: {}]   ;;  %s1032_s5 = inlined_call_operand.hbm [shape: bf16[128,128], index: 5, kind: input, shape index: {}]   ;;  %s1033_s6 = inlined_call_operand.vmem [shape: f32[1,128], index: 6, kind: input, shape index: {}]   ;;  %s1034_s7 = inlined_call_operand.hbm [shape: bf16[128,128], index: 7, kind: input, shape index: {}]   ;;  %s1035_s8 = inlined_call_operand.vmem [shape: f32[1,128], index: 8, kind: input, shape index: {}]   ;;  %s1036_s9 = inlined_call_operand.hbm [shape: f32[16,128], index: 9, kind: output, shape index: {}]  }
   0x1   :  { %15 = vsyncpa [#allocation6], 0 }
   0x2   :  { %16 = vsyncpa [#allocation9], 0  ;;  %s35_s11 = sshll.u32 %s1028_s1, 4  ;;  %s36_s11 = int_to_ptr.hbm [resolvable:$true] %s35_s11 }
   0x3   :  { %17 = vsyncpa [#allocation4], 0  ;;  %s923_s12 = smov [#allocation5]   ;;  %s65_s16 = sshll.u32 %s1032_s5, 4  ;;  %s66_s16 = int_to_ptr.hbm [resolvable:$true] %s65_s16 }
   0x4   :  { %s37_s13 = sshll.u32 %s923_s12, 4  ;;  %s924_s17 = smov 64   ;;  %s38_s13 = int_to_ptr.vmem [resolvable:$true] %s37_s13 }
   0x5   :  { %s925_s18 = smov 4   ;;  %s926_s19 = smov [#allocation8]  }
   0x6   :  { %43 = dma.hbm_to_vmem [thread:$0]  %s36_s11, 2048, %s38_s13, [#allocation6], %s924_s17, %s924_s17, %s925_s18  }
   0x7   :  { %s67_s20 = sshll.u32 %s926_s19, 4  ;;  %s22_s22 = sshll.u32 %s1027_s0, 4  ;;  %s68_s20 = int_to_ptr.vmem [resolvable:$true] %s67_s20  ;;  %s23_s22 = int_to_ptr.hbm [resolvable:$true] %s22_s22 }
   0x8   :  { %73 = dma.hbm_to_vmem [thread:$0]  %s66_s16, 1024, %s68_s20, [#allocation9], %s924_s17, %s924_s17, %s925_s18  }
   0x9   :  { %s927_s5 = smov [#allocation2]   ;;  %s50_s26 = sshll.u32 %s1030_s3, 4  ;;  %s51_s26 = int_to_ptr.hbm [resolvable:$true] %s50_s26 }
   0xa   :  { %s24_s23 = sshll.u32 %s927_s5, 4  ;;  %s928_s27 = smov 256   ;;  %s25_s23 = int_to_ptr.vmem [resolvable:$true] %s24_s23 }
   0xb   :  { %s929_s28 = smov 16   ;;  %s930_s29 = smov [#allocation7]  }
   0xc   :  { %30 = dma.hbm_to_vmem [thread:$0]  %s23_s22, 512, %s25_s23, [#allocation3], %s928_s27, %s928_s27, %s929_s28  }
   0xd   :  { %s52_s30 = sshll.u32 %s930_s29, 4  ;;  %s80_s11 = sshll.u32 %s1034_s7, 4  ;;  %s53_s30 = int_to_ptr.vmem [resolvable:$true] %s52_s30  ;;  %s81_s11 = int_to_ptr.hbm [resolvable:$true] %s80_s11 }
   0xe   :  { %58 = dma.hbm_to_vmem [thread:$0]  %s51_s26, 1024, %s53_s30, [#allocation6], %s924_s17, %s924_s17, %s925_s18  }
   0xf   :  { %s931_s12 = smov [#allocation10]  }
  0x10   :  { %s82_s13 = sshll.u32 %s931_s12, 4  ;;  %s83_s13 = int_to_ptr.vmem [resolvable:$true] %s82_s13 }
  0x11   :  { %88 = dma.hbm_to_vmem [thread:$0]  %s81_s11, 1024, %s83_s13, [#allocation9], %s924_s17, %s924_s17, %s925_s18  }
  0x12   :  { %915 = dma.done.wait [#allocation3], 512  }
  0x13   :  { %916 = vsyncadd [#allocation3], 4294966784 }
  0x14   :  { %917 = dma.done.wait [#allocation6], 3072  }
  0x15   :  { %918 = vsyncadd [#allocation6], 4294964224 }
  0x16   :  { %919 = dma.done.wait [#allocation9], 2048  }
  0x17   :  { %920 = vsyncadd [#allocation9], 4294965248  ;;  %v722_v0 = vld [vmem:[#allocation5 + $0x38] sm:$0xff]  ;;  %v721_v2 = vld [vmem:[#allocation5 + $0x30] sm:$0xff]  ;;  %s932_s18 = smov [#allocation11]   ;;  %s933_s1 = smov 128  }
  0x18   :  { %v730_v1 = vld [vmem:[#allocation5 + $0x78] sm:$0xff]  ;;  %249 = vmatpush.bf16.msra.mxu0 %v722_v0  ;;  %v729_v3 = vld [vmem:[#allocation5 + $0x70] sm:$0xff]  ;;  %v720_v4 = vld [vmem:[#allocation5 + $0x28] sm:$0xff]  ;;  %s538_s19 = sshll.u32 %s932_s18, 4  ;;  %s934_s22 = smov 8   ;;  %s539_s19 = int_to_ptr.vmem [resolvable:$true] %s538_s19 }
  0x19   :  { %263 = vmatpush.bf16.msra.mxu1 %v730_v1  ;;  %v728_v5 = vld [vmem:[#allocation5 + $0x68] sm:$0xff]  ;;  %v738_v6 = vld [vmem:[#allocation7 + $0x38] sm:$0xff]  ;;  %v737_v7 = vld [vmem:[#allocation7 + $0x30] sm:$0xff] }
  0x1a   :  { %348 = vmatpush.bf16.msra.mxu2 %v738_v6  ;;  %v719_v8 = vld [vmem:[#allocation5 + $0x20] sm:$0xff]  ;;  %v736_v10 = vld [vmem:[#allocation7 + $0x28] sm:$0xff]  ;;  %v718_v11 = vld [vmem:[#allocation5 + $0x18] sm:$0xff] }
  0x1b   :  { %v727_v9 = vld [vmem:[#allocation5 + $0x60] sm:$0xff]  ;;  %v726_v12 = vld [vmem:[#allocation5 + $0x58] sm:$0xff]  ;;  %v717_v14 = vld [vmem:[#allocation5 + $0x10] sm:$0xff] }
  0x1c   :  { %250 = vmatpush.bf16.msra.mxu0 %v721_v2  ;;  %v735_v13 = vld [vmem:[#allocation7 + $0x20] sm:$0xff]  ;;  %v725_v15 = vld [vmem:[#allocation5 + $0x50] sm:$0xff]  ;;  %v716_v16 = vld [vmem:[#allocation5 + $0x8] sm:$0xff] }
  0x1d   :  { %264 = vmatpush.bf16.msra.mxu1 %v729_v3  ;;  %v724_v17 = vld [vmem:[#allocation5 + $0x48] sm:$0xff]  ;;  %v715_v18 = vld [vmem:[#allocation5] sm:$0xff]  ;;  %v113_v21 = vld [vmem:[#allocation2 + $0x10] sm:$0xff] }
  0x1e   :  { %349 = vmatpush.bf16.msra.mxu2 %v737_v7  ;;  %v723_v19 = vld [vmem:[#allocation5 + $0x40] sm:$0xff]  ;;  %v112_v22 = vld [vmem:[#allocation2 + $0x8] sm:$0xff]  ;;  %v114_v23 = vld [vmem:[#allocation2 + $0x18] sm:$0xff] }
  0x1f   :  { %v111_v20 = vld [vmem:[#allocation2] sm:$0xff]  ;;  %v116_v25 = vpack.c.bf16 %v114_v23, %v112_v22  ;;  %v734_v26 = vld [vmem:[#allocation7 + $0x18] sm:$0xff]  ;;  %v733_v27 = vld [vmem:[#allocation7 + $0x10] sm:$0xff] }
  0x20   :  { %251 = vmatpush.bf16.msra.mxu0 %v720_v4  ;;  %v115_v24 = vpack.c.bf16 %v113_v21, %v111_v20  ;;  %v732_v28 = vld [vmem:[#allocation7 + $0x8] sm:$0xff]  ;;  %v731_v29 = vld [vmem:[#allocation7] sm:$0xff]  ;;  %v746_v30 = vld [vmem:[#allocation8 + $0x38] sm:$0xff] }
  0x21   :  { %265 = vmatpush.bf16.msra.mxu1 %v728_v5  ;;  %433 = vmatpush.bf16.msra.mxu3 %v746_v30  ;;  %v745_v31 = vld [vmem:[#allocation8 + $0x30] sm:$0xff]  ;;  %v744_v32 = vld [vmem:[#allocation8 + $0x28] sm:$0xff]  ;;  %v743_v33 = vld [vmem:[#allocation8 + $0x20] sm:$0xff] }
  0x22   :  { %350 = vmatpush.bf16.msra.mxu2 %v736_v10  ;;  %v767_v36 = vld [vmem:[%s1029_s2] ss:$0 sm:$0xff]  ;;  %v742_v46 = vld [vmem:[#allocation8 + $0x18] sm:$0xff]  ;;  %v741_v47 = vld [vmem:[#allocation8 + $0x10] sm:$0xff] }
  0x23   :  { %v740_v48 = vld [vmem:[#allocation8 + $0x8] sm:$0xff]  ;;  %v739_v49 = vld [vmem:[#allocation8] sm:$0xff]  ;;  %v754_v50 = vld [vmem:[#allocation10 + $0x38] sm:$0xff] }
  0x24   :  { %252 = vmatpush.bf16.msra.mxu0 %v719_v8  ;;  %v753_v51 = vld [vmem:[#allocation10 + $0x30] sm:$0xff]  ;;  %v752_v52 = vld [vmem:[#allocation10 + $0x28] sm:$0xff]  ;;  %v751_v53 = vld [vmem:[#allocation10 + $0x20] sm:$0xff] }
  0x25   :  { %266 = vmatpush.bf16.msra.mxu1 %v727_v9  ;;  %434 = vmatpush.bf16.msra.mxu3 %v745_v31  ;;  %v768_v55 = vld [vmem:[%s1031_s4] ss:$0 sm:$0xff]  ;;  %v750_v62 = vld [vmem:[#allocation10 + $0x18] sm:$0xff]  ;;  %v749_v63 = vld [vmem:[#allocation10 + $0x10] sm:$0xff] }
  0x26   :  { %351 = vmatpush.bf16.msra.mxu2 %v735_v13  ;;  %v748_v0 = vld [vmem:[#allocation10 + $0x8] sm:$0xff]  ;;  %v747_v1 = vld [vmem:[#allocation10] sm:$0xff] }
  0x27   :  { %v769_v3 = vld [vmem:[%s1033_s6] ss:$0 sm:$0xff]  ;;  %s540_s6 = sshll.u32 %s1036_s9, 4  ;;  %s541_s6 = int_to_ptr.hbm [resolvable:$true] %s540_s6 }
  0x28   :  { %253 = vmatpush.bf16.msra.mxu0 %v718_v11  ;;  %v770_v10 = vld [vmem:[%s1035_s8] ss:$0 sm:$0xff] }
  0x29   :  { %267 = vmatpush.bf16.msra.mxu1 %v726_v12  ;;  %435 = vmatpush.bf16.msra.mxu3 %v744_v32 }
  0x2a   :  { %352 = vmatpush.bf16.msra.mxu2 %v734_v26 }
  0x2c   :  { %254 = vmatpush.bf16.msra.mxu0 %v717_v14 }
  0x2d   :  { %268 = vmatpush.bf16.msra.mxu1 %v725_v15  ;;  %436 = vmatpush.bf16.msra.mxu3 %v743_v33 }
  0x2e   :  { %353 = vmatpush.bf16.msra.mxu2 %v733_v27 }
  0x30   :  { %255 = vmatpush.bf16.msra.mxu0 %v716_v16 }
  0x31   :  { %269 = vmatpush.bf16.msra.mxu1 %v724_v17  ;;  %437 = vmatpush.bf16.msra.mxu3 %v742_v46 }
  0x32   :  { %354 = vmatpush.bf16.msra.mxu2 %v732_v28 }
  0x34   :  { %256 = vmatpush.bf16.msra.mxu0 %v715_v18 }
  0x35   :  { %270 = vmatpush.bf16.msra.mxu1 %v723_v19  ;;  %438 = vmatpush.bf16.msra.mxu3 %v741_v47 }
  0x36   :  { %355 = vmatpush.bf16.msra.mxu2 %v731_v29 }
  0x37   :  { %257 = vmatmul.bf16.vlgmr.msra.gmra.mxu0 %v115_v24 }
  0x38   :  { %271 = vmatmul.bf16.vlgmr.msra.gmra.mxu1 %v116_v25  ;;  %518 = vmatpush.bf16.msrb.mxu0 %v754_v50 }
  0x39   :  { %439 = vmatpush.bf16.msra.mxu3 %v740_v48 }
  0x3c   :  { %519 = vmatpush.bf16.msrb.mxu0 %v753_v51 }
  0x3d   :  { %440 = vmatpush.bf16.msra.mxu3 %v739_v49 }
  0x40   :  { %520 = vmatpush.bf16.msrb.mxu0 %v752_v52 }
  0x44   :  { %521 = vmatpush.bf16.msrb.mxu0 %v751_v53 }
  0x48   :  { %522 = vmatpush.bf16.msrb.mxu0 %v750_v62 }
  0x4c   :  { %523 = vmatpush.bf16.msrb.mxu0 %v749_v63 }
  0x50   :  { %524 = vmatpush.bf16.msrb.mxu0 %v748_v0 }
  0x54   :  { %525 = vmatpush.bf16.msrb.mxu0 %v747_v1 }
  0xb4   :  { %v258_v34 = vpop.f32.mrf.mxu0 }
  0xb5   :  { %v272_v35 = vpop.f32.mrf.mxu1  ;;  %v259_v37 = vadd.f32 %v767_v36, %v258_v34 }
  0xb7   :  { %v273_v39 = vadd.f32 %v272_v35, %v259_v37 }
  0xb9   :  { %v277_v43 = vmax.f32 %v273_v39, 0.0 }
  0xbc   :  { %v260_v38 = vpop.f32.mrf.mxu0 }
  0xbd   :  { %v261_v40 = vadd.f32 %v767_v36, %v260_v38  ;;  %v274_v41 = vpop.f32.mrf.mxu1 }
  0xbf   :  { %v275_v42 = vadd.f32 %v274_v41, %v261_v40 }
  0xc1   :  { %v278_v44 = vmax.f32 %v275_v42, 0.0 }
  0xc3   :  { %v279_v45 = vpack.c.bf16 %v278_v44, %v277_v43 }
  0xc5   :  { %356 = vmatmul.bf16.vlgmr.msra.gmra.mxu2 %v279_v45 }
 0x148   :  { %v357_v54 = vpop.f32.mrf.mxu2 }
 0x149   :  { %v358_v56 = vadd.f32 %v768_v55, %v357_v54 }
 0x14b   :  { %v362_v59 = vmax.f32 %v358_v56, 0.0 }
 0x150   :  { %v359_v57 = vpop.f32.mrf.mxu2 }
 0x151   :  { %v360_v58 = vadd.f32 %v768_v55, %v359_v57 }
 0x153   :  { %v363_v60 = vmax.f32 %v360_v58, 0.0 }
 0x155   :  { %v364_v61 = vpack.c.bf16 %v363_v60, %v362_v59 }
 0x157   :  { %441 = vmatmul.bf16.vlgmr.msra.gmra.mxu3 %v364_v61 }
 0x1da   :  { %v442_v2 = vpop.f32.mrf.mxu3 }
 0x1db   :  { %v443_v4 = vadd.f32 %v769_v3, %v442_v2 }
 0x1dd   :  { %v447_v7 = vmax.f32 %v443_v4, 0.0 }
 0x1e2   :  { %v444_v5 = vpop.f32.mrf.mxu3 }
 0x1e3   :  { %v445_v6 = vadd.f32 %v769_v3, %v444_v5 }
 0x1e5   :  { %v448_v8 = vmax.f32 %v445_v6, 0.0 }
 0x1e7   :  { %v449_v9 = vpack.c.bf16 %v448_v8, %v447_v7 }
 0x1e9   :  { %526 = vmatmul.bf16.vlgmr.msrb.gmra.mxu0 %v449_v9 }
 0x266   :  { %v527_v11 = vpop.f32.mrf.mxu0 }
 0x267   :  { %v528_v12 = vadd.f32 %v770_v10, %v527_v11 }
 0x269   :  { %532 = vst [vmem:[#allocation11] sm:$0xff] %v528_v12 }
 0x26e   :  { %v529_v13 = vpop.f32.mrf.mxu0 }
 0x26f   :  { %v530_v14 = vadd.f32 %v770_v10, %v529_v13 }
 0x271   :  { %533 = vst [vmem:[#allocation11 + $0x8] sm:$0xff] %v530_v14 }
 0x272   :  { %546 = dma.vmem_to_hbm [thread:$0]  %s539_s19, 256, %s541_s6, [#allocation4], %s933_s1, %s933_s1, %s934_s22  }
 0x273   :  { %921 = dma.done.wait [#allocation4], 256  }
 0x274   :  { %922 = vsyncadd [#allocation4], 4294967040 }
 0x275   :  { %551 = vsyncpa [#allocation3], 1 }
 0x276   :  { %552 = vsyncpa [#allocation6], 1 }
 0x277   :  { %553 = vsyncpa [#allocation9], 1 }
 0x278   :  { %554 = vsyncpa [#allocation4], 1 }

</bundles_post_ra>
